<compile_context>
chip_gen: v6e
topology: v6e:2x2x1
jax: 0.10.0
libtpu: 0.0.40
codegen_flags: <defaults>
</compile_context>

<pallas_src>
import functools

import jax
import jax.numpy as jnp
import numpy as np
from jax.experimental import pallas as pl
from jax.experimental.pallas import tpu as pltpu

BETA = 0.5
M2 = 1.0


def _round_up(x, m):
    return ((x + m - 1) // m) * m


def default_transcendental_dtype():
    """bf16 transcendentals only where the EUP supports bf16 (v6e / v7x)."""
    try:
        kind = jax.devices()[0].device_kind.lower()
    except Exception:
        return jnp.float32
    if any(tok in kind for tok in ("v6", "v7", "7x", "trillium")):
        return jnp.bfloat16
    return jnp.float32  # v5e and older: no bf16 EUP/VPU -> keep f32


def cp_kernel(phi_ref, a_ref, b_ref, detj_ref, o_ref, *, beta, m2, tdt):
    phi = phi_ref[...]          # (tB, L) real MCMC samples, f32
    a = a_ref[...]              # (1, L) deformation shift
    b = b_ref[...]              # (1, L) deformation slope
    L = phi.shape[-1]

    # Deformation: phi~ = phi + i*ti,  ti = a + b*phi  (broadcast (1,L)->(tB,L))
    ti = a + b * phi

    # Periodic nearest-neighbour differences (only 2 XLU rolls needed).
    dphi = pltpu.roll(phi, L - 1, 1) - phi      # Re(z_{x+1} - z_x)
    dti = pltpu.roll(ti, L - 1, 1) - ti         # Im(z_{x+1} - z_x)

    # Action difference dS = S(phi~) - S(phi) for the quadratic action.
    # Because Re(phi~) == phi, the real per-site integrands cancel exactly and
    #   Re(dS) = -0.5*beta * sum_x ( dti^2 + m2*ti^2 )
    #   Im(dS) =      beta * sum_x ( dphi*dti + m2*phi*ti )
    # This is algebraically identical to computing S0 (real) and S~ (complex)
    # and subtracting, but avoids the wasted zero-imag work and cancellation.
    # (Constant 0.5*beta scaling is hoisted out of the reduction.)
    dact_r = dti * dti + m2 * (ti * ti)         # (tB, L) f32
    dact_i = dphi * dti + m2 * (phi * ti)       # (tB, L) f32

    # Lane reductions on the MXU (matmul against a ones matrix) instead of the
    # contended XLU; result columns are identical, keep column 0.
    ones_f32 = jnp.ones((L, 128), jnp.float32)

    def _lane_sum_f32(x):
        return jnp.dot(x, ones_f32, preferred_element_type=jnp.float32)[:, 0:1]

    dS_r = (-0.5 * beta) * _lane_sum_f32(dact_r)    # (tB, 1)
    dS_i = beta * _lane_sum_f32(dact_i)             # (tB, 1)

    # obs(phi~) = (1/L) sum_x exp(i*phi~_x) = (1/L) sum_x e^{-ti}(cos phi + i sin phi)
    # Full-tile transcendentals in `tdt` (bf16 on v6e/v7x, f32 on v5e);
    # the mean accumulates in f32 on the MXU.
    tr_t = phi.astype(tdt)
    ti_t = ti.astype(tdt)
    amp = jnp.exp(-ti_t)
    obs_int_r = amp * jnp.cos(tr_t)
    obs_int_i = amp * jnp.sin(tr_t)
    ones_t = jnp.ones((L, 128), tdt)
    inv_L = 1.0 / L

    def _lane_sum_t(x):
        return jnp.dot(x, ones_t, preferred_element_type=jnp.float32)[:, 0:1]

    obs_r = inv_L * _lane_sum_t(obs_int_r)          # (tB, 1) f32
    obs_i = inv_L * _lane_sum_t(obs_int_i)          # (tB, 1) f32

    # reweight = exp(-dS) (complex); per-row scalars, kept in f32.
    # TODO(synk): exp(-Re(dS)) can over/underflow in f32 for very strong
    # deformations; left unclamped to match the module's semantics.
    w = jnp.exp(-dS_r)
    rw_r = w * jnp.cos(dS_i)
    rw_i = -w * jnp.sin(dS_i)

    # t = obs * reweight
    t_r = obs_r * rw_r - obs_i * rw_i
    t_i = obs_r * rw_i + obs_i * rw_r

    # O = t * detJ   (data-independent complex scalar, read from SMEM)
    dj_r = detj_ref[0]
    dj_i = detj_ref[1]
    o_r = t_r * dj_r - t_i * dj_i
    o_i = t_r * dj_i + t_i * dj_r

    # Single merged store of both components.
    o_ref[...] = jnp.concatenate([o_r, o_i], axis=-1)


@functools.partial(
    jax.jit, static_argnames=("beta", "m2", "tb", "transcendental_dtype"))
def cp_forward(phi, a, b, detj, *, beta=BETA, m2=M2, tb=512,
               transcendental_dtype=jnp.float32):
    B, L = phi.shape
    # Effective batch tile: as large as possible (amortizes the ~0.35us
    # per-grid-step pipeline overhead) but never larger than the padded batch.
    tb_eff = _round_up(min(tb, _round_up(B, 8)), 8)
    n_blocks = pl.cdiv(B, tb_eff)
    B_pad = n_blocks * tb_eff
    if B_pad != B:
        # Pad the tail with zero rows (computed then dropped) -- no silently
        # missing rows when B is not a multiple of the tile.
        phi = jnp.pad(phi, ((0, B_pad - B), (0, 0)))

    kernel = functools.partial(cp_kernel, beta=beta, m2=m2,
                               tdt=transcendental_dtype)
    out = pl.pallas_call(
        kernel,
        out_shape=jax.ShapeDtypeStruct((B_pad, 2), jnp.float32),
        grid=(n_blocks,),
        in_specs=[
            pl.BlockSpec((tb_eff, L), lambda i: (i, 0)),               # phi tile
            pl.BlockSpec((1, L), lambda i: (0, 0)),                    # a (replicated)
            pl.BlockSpec((1, L), lambda i: (0, 0)),                    # b (replicated)
            pl.BlockSpec(memory_space=pltpu.MemorySpace.SMEM),         # detJ (re, im)
        ],
        out_specs=pl.BlockSpec((tb_eff, 2), lambda i: (i, 0)),
        compiler_params=pltpu.CompilerParams(
            dimension_semantics=("parallel",)),
    )(phi, a, b, detj)
    return out[:B]


def cp_reference_np(phi, a, b, beta, m2):
    """Pure-numpy (float64/complex128) reference of the same forward."""
    phi = np.asarray(phi, dtype=np.float64)
    a = np.asarray(a, dtype=np.float64)
    b = np.asarray(b, dtype=np.float64)

    def S(z):
        zn = np.roll(z, -1, axis=-1)
        return beta * np.sum(0.5 * (zn - z) ** 2 + 0.5 * m2 * z ** 2, axis=-1)

    S0 = S(phi)
    phit = phi + 1j * (a + b * phi)
    detJ = np.prod(1.0 + 1j * b)
    St = S(phit)
    obs = np.mean(np.exp(1j * phit), axis=-1)
    return obs * detJ * np.exp(-(St - S0))


if __name__ == "__main__":
    B, L = 16, 128
    key = jax.random.PRNGKey(0)
    phi = 0.3 * jax.random.normal(key, (B, L), dtype=jnp.float32)

    # Deterministic deformation parameters (the nn.Module's learnable params).
    x = jnp.arange(L, dtype=jnp.float32)
    a1d = 0.10 * jnp.cos(2.0 * jnp.pi * x / L)
    b1d = 0.05 * jnp.sin(2.0 * jnp.pi * x / L)
    a = a1d.reshape(1, L)
    b = b1d.reshape(1, L)

    # detJ = prod_x (1 + i*b_x): parameter-only glue, computed outside the kernel.
    detJ_np = np.prod(1.0 + 1j * np.asarray(b1d, dtype=np.float64))
    detj = jnp.array([detJ_np.real, detJ_np.imag], dtype=jnp.float32)

    tdt = default_transcendental_dtype()
    out = cp_forward(phi, a, b, detj, transcendental_dtype=tdt)
    out = jax.block_until_ready(out)

    ref = cp_reference_np(phi, a1d, b1d, BETA, M2)
    ref_ri = np.stack([ref.real, ref.imag], axis=-1)
    if tdt == jnp.bfloat16:
        rtol, atol = 1.5e-2, 1.5e-3   # bf16 transcendental path (v6e / v7x)
    else:
        rtol, atol = 2e-3, 1e-4       # f32 path (v5e and older)
    np.testing.assert_allclose(np.asarray(out), ref_ri, rtol=rtol, atol=atol)

    # TODO(synk): the original module is generic over (action, deformation, obs)
    # callables; only the concrete toy instantiation above is compiled here.
    print("KERNEL_OK")
</pallas_src>

<mosaic_0001>
module attributes {stable_mosaic.version = 11 : i64} {
  func.func @cp_kernel(%arg0: i32, %arg1: memref<16x128xf32, #tpu.memory_space<vmem>>, %arg2: memref<1x128xf32, #tpu.memory_space<vmem>>, %arg3: memref<1x128xf32, #tpu.memory_space<vmem>>, %arg4: memref<2xf32, #tpu.memory_space<smem>>, %arg5: memref<16x2xf32, #tpu.memory_space<vmem>>) attributes {dimension_semantics = [#tpu.dimension_semantics<parallel>], iteration_bounds = array<i64: 1>, scalar_prefetch = 0 : i64, scratch_operands = 0 : i64, tpu.core_type = #tpu.core_type<tc>, window_params = [{transform_indices = @transform_0, window_bounds = array<i64: 16, 128>}, {pipeline_mode = #tpu.pipeline_mode<synchronous>, transform_indices = @transform_1, window_bounds = array<i64: 1, 128>}, {pipeline_mode = #tpu.pipeline_mode<synchronous>, transform_indices = @transform_2, window_bounds = array<i64: 1, 128>}, {transform_indices = @transform_3, window_bounds = array<i64: 2>}, {transform_indices = @transform_4, window_bounds = array<i64: 16, 2>}]} {
    %c0 = arith.constant 0 : index
    %c0_0 = arith.constant 0 : index
    %0 = vector.load %arg1[%c0, %c0_0] : memref<16x128xf32, #tpu.memory_space<vmem>>, vector<16x128xf32>
    %c0_1 = arith.constant 0 : index
    %c0_2 = arith.constant 0 : index
    %1 = vector.load %arg2[%c0_1, %c0_2] : memref<1x128xf32, #tpu.memory_space<vmem>>, vector<1x128xf32>
    %c0_3 = arith.constant 0 : index
    %c0_4 = arith.constant 0 : index
    %2 = vector.load %arg3[%c0_3, %c0_4] : memref<1x128xf32, #tpu.memory_space<vmem>>, vector<1x128xf32>
    %3 = vector.broadcast %2 : vector<1x128xf32> to vector<16x128xf32>
    %4 = arith.mulf %3, %0 : vector<16x128xf32>
    %5 = vector.broadcast %1 : vector<1x128xf32> to vector<16x128xf32>
    %6 = arith.addf %5, %4 : vector<16x128xf32>
    %c127_i32 = arith.constant 127 : i32
    %7 = tpu.dynamic_rotate %0 by %c127_i32 dim 1 : vector<16x128xf32>, i32 -> vector<16x128xf32>
    %8 = arith.subf %7, %0 : vector<16x128xf32>
    %c127_i32_5 = arith.constant 127 : i32
    %9 = tpu.dynamic_rotate %6 by %c127_i32_5 dim 1 : vector<16x128xf32>, i32 -> vector<16x128xf32>
    %10 = arith.subf %9, %6 : vector<16x128xf32>
    %11 = arith.mulf %10, %10 : vector<16x128xf32>
    %12 = arith.mulf %6, %6 : vector<16x128xf32>
    %cst = arith.constant 1.000000e+00 : f32
    %13 = vector.broadcast %cst : f32 to vector<16x128xf32>
    %14 = arith.mulf %13, %12 : vector<16x128xf32>
    %15 = arith.addf %11, %14 : vector<16x128xf32>
    %16 = arith.mulf %8, %10 : vector<16x128xf32>
    %17 = arith.mulf %0, %6 : vector<16x128xf32>
    %cst_6 = arith.constant 1.000000e+00 : f32
    %18 = vector.broadcast %cst_6 : f32 to vector<16x128xf32>
    %19 = arith.mulf %18, %17 : vector<16x128xf32>
    %20 = arith.addf %16, %19 : vector<16x128xf32>
    %cst_7 = arith.constant 1.000000e+00 : f32
    %21 = vector.broadcast %cst_7 : f32 to vector<128x128xf32>
    %cst_8 = arith.constant dense<0.000000e+00> : vector<16x128xf32>
    %22 = tpu.matmul %15, %21, %cst_8 {dimension_numbers = #tpu.dot_dimension_numbers<[1], [0], [0], [1], [0, 0, 1, 1], [], []>} : vector<16x128xf32>, vector<128x128xf32>, vector<16x128xf32> -> vector<16x128xf32>
    %23 = vector.extract_strided_slice %22 {offsets = [0, 0], sizes = [16, 1], strides = [1, 1]} : vector<16x128xf32> to vector<16x1xf32>
    %cst_9 = arith.constant -2.500000e-01 : f32
    %24 = vector.broadcast %cst_9 : f32 to vector<16x1xf32>
    %25 = arith.mulf %24, %23 : vector<16x1xf32>
    %cst_10 = arith.constant dense<0.000000e+00> : vector<16x128xf32>
    %26 = tpu.matmul %20, %21, %cst_10 {dimension_numbers = #tpu.dot_dimension_numbers<[1], [0], [0], [1], [0, 0, 1, 1], [], []>} : vector<16x128xf32>, vector<128x128xf32>, vector<16x128xf32> -> vector<16x128xf32>
    %27 = vector.extract_strided_slice %26 {offsets = [0, 0], sizes = [16, 1], strides = [1, 1]} : vector<16x128xf32> to vector<16x1xf32>
    %cst_11 = arith.constant 5.000000e-01 : f32
    %28 = vector.broadcast %cst_11 : f32 to vector<16x1xf32>
    %29 = arith.mulf %28, %27 : vector<16x1xf32>
    %cst_12 = arith.constant 0.000000e+00 : f32
    %30 = vector.broadcast %cst_12 : f32 to vector<16x128xf32>
    %31 = arith.subf %30, %6 : vector<16x128xf32>
    %32 = math.exp %31 : vector<16x128xf32>
    %33 = math.cos %0 : vector<16x128xf32>
    %34 = arith.mulf %32, %33 : vector<16x128xf32>
    %35 = math.sin %0 : vector<16x128xf32>
    %36 = arith.mulf %32, %35 : vector<16x128xf32>
    %cst_13 = arith.constant 1.000000e+00 : f32
    %37 = vector.broadcast %cst_13 : f32 to vector<128x128xf32>
    %cst_14 = arith.constant dense<0.000000e+00> : vector<16x128xf32>
    %38 = tpu.matmul %34, %37, %cst_14 {dimension_numbers = #tpu.dot_dimension_numbers<[1], [0], [0], [1], [0, 0, 1, 1], [], []>} : vector<16x128xf32>, vector<128x128xf32>, vector<16x128xf32> -> vector<16x128xf32>
    %39 = vector.extract_strided_slice %38 {offsets = [0, 0], sizes = [16, 1], strides = [1, 1]} : vector<16x128xf32> to vector<16x1xf32>
    %cst_15 = arith.constant 7.812500e-03 : f32
    %40 = vector.broadcast %cst_15 : f32 to vector<16x1xf32>
    %41 = arith.mulf %40, %39 : vector<16x1xf32>
    %cst_16 = arith.constant dense<0.000000e+00> : vector<16x128xf32>
    %42 = tpu.matmul %36, %37, %cst_16 {dimension_numbers = #tpu.dot_dimension_numbers<[1], [0], [0], [1], [0, 0, 1, 1], [], []>} : vector<16x128xf32>, vector<128x128xf32>, vector<16x128xf32> -> vector<16x128xf32>
    %43 = vector.extract_strided_slice %42 {offsets = [0, 0], sizes = [16, 1], strides = [1, 1]} : vector<16x128xf32> to vector<16x1xf32>
    %cst_17 = arith.constant 7.812500e-03 : f32
    %44 = vector.broadcast %cst_17 : f32 to vector<16x1xf32>
    %45 = arith.mulf %44, %43 : vector<16x1xf32>
    %cst_18 = arith.constant 0.000000e+00 : f32
    %46 = vector.broadcast %cst_18 : f32 to vector<16x1xf32>
    %47 = arith.subf %46, %25 : vector<16x1xf32>
    %48 = math.exp %47 : vector<16x1xf32>
    %49 = math.cos %29 : vector<16x1xf32>
    %50 = arith.mulf %48, %49 : vector<16x1xf32>
    %cst_19 = arith.constant 0.000000e+00 : f32
    %51 = vector.broadcast %cst_19 : f32 to vector<16x1xf32>
    %52 = arith.subf %51, %48 : vector<16x1xf32>
    %53 = math.sin %29 : vector<16x1xf32>
    %54 = arith.mulf %52, %53 : vector<16x1xf32>
    %55 = arith.mulf %41, %50 : vector<16x1xf32>
    %56 = arith.mulf %45, %54 : vector<16x1xf32>
    %57 = arith.subf %55, %56 : vector<16x1xf32>
    %58 = arith.mulf %41, %54 : vector<16x1xf32>
    %59 = arith.mulf %45, %50 : vector<16x1xf32>
    %60 = arith.addf %58, %59 : vector<16x1xf32>
    %c0_20 = arith.constant 0 : index
    %61 = memref.load %arg4[%c0_20] : memref<2xf32, #tpu.memory_space<smem>>
    %c1 = arith.constant 1 : index
    %62 = memref.load %arg4[%c1] : memref<2xf32, #tpu.memory_space<smem>>
    %63 = vector.broadcast %61 : f32 to vector<16x1xf32>
    %64 = arith.mulf %57, %63 : vector<16x1xf32>
    %65 = vector.broadcast %62 : f32 to vector<16x1xf32>
    %66 = arith.mulf %60, %65 : vector<16x1xf32>
    %67 = arith.subf %64, %66 : vector<16x1xf32>
    %68 = vector.broadcast %62 : f32 to vector<16x1xf32>
    %69 = arith.mulf %57, %68 : vector<16x1xf32>
    %70 = vector.broadcast %61 : f32 to vector<16x1xf32>
    %71 = arith.mulf %60, %70 : vector<16x1xf32>
    %72 = arith.addf %69, %71 : vector<16x1xf32>
    %73 = tpu.concatenate %67, %72 in 1 : vector<16x1xf32>, vector<16x1xf32> -> vector<16x2xf32>
    %c0_21 = arith.constant 0 : index
    %c0_22 = arith.constant 0 : index
    %74 = vector.load %arg5[%c0_21, %c0_22] : memref<16x2xf32, #tpu.memory_space<vmem>>, vector<16x2xf32>
    tpu.vector_store %arg5[%c0_21, %c0_22], %73 {strides = array<i32>} : memref<16x2xf32, #tpu.memory_space<vmem>>, vector<16x2xf32>,
    return
  }
  func.func @transform_0(%arg0: i32) -> (i32, i32) {
    %c0_i32 = arith.constant 0 : i32
    %c0_i32_0 = arith.constant 0 : i32
    return %arg0, %c0_i32 : i32, i32
  }
  func.func @transform_1(%arg0: i32) -> (i32, i32) {
    %c0_i32 = arith.constant 0 : i32
    %c0_i32_0 = arith.constant 0 : i32
    %c0_i32_1 = arith.constant 0 : i32
    return %c0_i32, %c0_i32_0 : i32, i32
  }
  func.func @transform_2(%arg0: i32) -> (i32, i32) {
    %c0_i32 = arith.constant 0 : i32
    %c0_i32_0 = arith.constant 0 : i32
    %c0_i32_1 = arith.constant 0 : i32
    return %c0_i32, %c0_i32_0 : i32, i32
  }
  func.func @transform_3(%arg0: i32) -> i32 {
    %c0_i32 = arith.constant 0 : i32
    %c0_i32_0 = arith.constant 0 : i32
    return %c0_i32 : i32
  }
  func.func @transform_4(%arg0: i32) -> (i32, i32) {
    %c0_i32 = arith.constant 0 : i32
    %c0_i32_0 = arith.constant 0 : i32
    return %arg0, %c0_i32 : i32, i32
  }
}

</mosaic_0001>

<bundles_post_ra>
// kernel: cp_forward.1
= control target key start
LH: loop header
LB: loop body
LE: loop exit
PB: predicated region body
PF: predicated region fallthrough
CT: control target
= control target key end

     0   :  { %9 = vsyncpa [#allocation3], 0  ;;  %s2155_s0 = inlined_call_operand.hbm [shape: f32[16,128], index: 0, kind: input, shape index: {}]   ;;  %s2156_s1 = inlined_call_operand.vmem [shape: f32[1,128], index: 1, kind: input, shape index: {}]   ;;  %s2157_s2 = inlined_call_operand.vmem [shape: f32[1,128], index: 2, kind: input, shape index: {}]   ;;  %s2158_s3 = inlined_call_operand.vmem [shape: f32[2], index: 3, kind: input, shape index: {}]   ;;  %s2159_s4 = inlined_call_operand.vmem [shape: f32[16,2], index: 4, kind: output, shape index: {}]  }
   0x1   :  { %10 = vsyncpa [#allocation4], 0  ;;  %s1630_s15 = smov [#allocation2]   ;;  %s33_s19 = sshll.u32 %s2158_s3, 4  ;;  %s34_s19 = int_to_ptr.vmem [resolvable:$true] %s33_s19 }
   0x2   :  { %s16_s16 = sshll.u32 %s1630_s15, 4  ;;  %s17_s16 = int_to_ptr.vmem [resolvable:$true] %s16_s16 }
   0x3   :  { %s1602_s20 = scalar_lea.vmem %s17_s16, 256  ;;  %p1607_p1 = scmp.lt.s32.totalorder %s17_s16, %s17_s16 }
   0x4   :  { %p1603_p0 = scmp.ne.s32.totalorder %s17_s16, %s1602_s20  ;;  %p1608_p2 = scmp.lt.s32.totalorder %s1602_s20, %s1602_s20 }
   0x6   :  { %p1609_p3 = por %p1608_p2, %p1607_p1 }
   0x8   :  { %p1610_p4 = pnand %p1609_p3, %p1603_p0 }
   0xa   :  { %1613 = shalt.err (!%p1610_p4)
}
   0xb   :  { %s1631_s21 = smov 128   ;;  %s1632_s22 = smov 8  }
   0xc   :  { %22 = dma.hbm_to_vmem [thread:$0]  %s2155_s0, 256, %s17_s16, [#allocation3], %s1631_s21, %s1631_s21, %s1632_s22  }
   0xd   :  { %s1614_s25 = scalar_lea.vmem %s34_s19, 16  ;;  %p1619_p6 = scmp.lt.s32.totalorder %s34_s19, %s34_s19 }
   0xe   :  { %p1615_p5 = scmp.ne.s32.totalorder %s34_s19, %s1614_s25  ;;  %p1620_p7 = scmp.lt.s32.totalorder %s1614_s25, %s1614_s25 }
  0x10   :  { %p1621_p8 = por %p1620_p7, %p1619_p6 }
  0x12   :  { %p1622_p9 = pnand %p1621_p8, %p1615_p5 }
  0x14   :  { %1625 = shalt.err (!%p1622_p9)
}
  0x15   :  { %s1633_s3 = smov [#allocation5]  }
  0x16   :  { %36 = dma.vmem_to_smem %s34_s19, 16, %s1633_s3, [#allocation4]  }
  0x17   :  { %1626 = dma.done.wait [#allocation3], 256  }
  0x18   :  { %1627 = vsyncadd [#allocation3], 4294967040 }
  0x19   :  { %1628 = dma.done.wait [#allocation4], 16  }
  0x1a   :  { %1629 = vsyncadd [#allocation4], 4294967280 }
  0x1b   :  { %43 = sfence }
  0x1c   :  { %v1674_v0 = vld [vmem:[#allocation2 + $0x8] sm:$0xff]  ;;  %v1676_v1 = vld [vmem:[#allocation2] sm:$0xff]  ;;  %s1634_s0 = smov 127   ;;  %v1635_v8 = vmov 1.0   ;;  %v1636_v21 = vmov 683565275  }
  0x1d   :  { %66 = vrot.lane.b32.xlu1 %v1674_v0, %s1634_s0  ;;  %v354_v2 = vand.u32 2139095040, %v1674_v0  ;;  %64 = vrot.lane.b32.xlu0 %v1676_v1, %s1634_s0  ;;  %v1295_v3 = vld [vmem:[%s2156_s1] ss:$0 sm:$0xff]  ;;  %v251_v5 = vand.u32 2139095040, %v1676_v1  ;;  %v248_v19 = vand.u32 2147483647, %v1676_v1 }
  0x1e   :  { %v1294_v4 = vld [vmem:[%s2157_s2] ss:$0 sm:$0xff]  ;;  %1401 = vmatprep.subr.mxu0 %v1635_v8  ;;  %1436 = vmatprep.subr.mxu1 %v1635_v8  ;;  %v1637_v23 = vmov 2475754826   ;;  %v1638_v25 = vmov 2131351028  }
  0x1f   :  { %v55_v6 = vmul.f32 %v1294_v4, %v1674_v0  ;;  %v54_v7 = vmul.f32 %v1294_v4, %v1676_v1  ;;  %v355_v9 = vshrl.u32 %v354_v2, 23  ;;  %1402 = vmatpush3.msra.mxu0 %v1635_v8  ;;  %1437 = vmatpush3.msra.mxu1 %v1635_v8  ;;  %v252_v10 = vshrl.u32 %v251_v5, 23  ;;  %s2133_s1 = sld [smem:[#allocation5]]  ;;  %s1642_s30 = smov 1  }
  0x20   :  { %1403 = vmatprep.subr.mxu0 %v1635_v8  ;;  %1438 = vmatprep.subr.mxu1 %v1635_v8  ;;  %v1639_v27 = vmov 2102212464   ;;  %v1640_v33 = vmov 920167782   ;;  %v1641_v36 = vmov 1326507024  }
  0x21   :  { %v1694_v11 = vadd.f32 %v1295_v3, %v55_v6  ;;  %v1696_v12 = vadd.f32 %v1295_v3, %v54_v7  ;;  %v1300_v13 = vadd.s32 4294967169, %v355_v9  ;;  %1404 = vmatpush3.msra.mxu0 %v1635_v8  ;;  %1439 = vmatpush3.msra.mxu1 %v1635_v8  ;;  %v1296_v14 = vadd.s32 4294967169, %v252_v10  ;;  %s1328_s2 = sld [smem:[#allocation5 + $0x1]] }
  0x22   :  { %1405 = vmatprep.subr.mxu0 %v1635_v8  ;;  %1440 = vmatprep.subr.mxu1 %v1635_v8  ;;  %v255_v42 = vand.u32 8388607, %v248_v19  ;;  %v351_v48 = vand.u32 2147483647, %v1674_v0  ;;  %vm250_vm14 = vcmp.lt.s32.totalorder %v1676_v1, 0 }
  0x23   :  { %72 = vrot.lane.b32.xlu1 %v1694_v11, %s1634_s0  ;;  %70 = vrot.lane.b32.xlu0 %v1696_v12, %s1634_s0  ;;  %v258_v15 = vadd.s32 1, %v1296_v14  ;;  %v361_v16 = vadd.s32 1, %v1300_v13  ;;  %vm1910_vm15 = vcmp.le.f32.partialorder %v248_v19, 0.7853982  ;;  %v85_v19 = vmul.f32 %v1694_v11, %v1674_v0 }
  0x24   :  { %1406 = vmatpush3.msra.mxu0 %v1635_v8  ;;  %1441 = vmatpush3.msra.mxu1 %v1635_v8  ;;  %v256_v49 = vor.u32 8388608, %v255_v42  ;;  %v358_v59 = vand.u32 8388607, %v351_v48 }
  0x25   :  { %1407 = vmatprep.subr.mxu0 %v1635_v8  ;;  %1442 = vmatprep.subr.mxu1 %v1635_v8  ;;  %vm259_vm0 = vcmp.gt.s32.totalorder %v258_v15, 0  ;;  %vm362_vm1 = vcmp.gt.s32.totalorder %v361_v16, 0 }
  0x26   :  { %1408 = vmatpush3.msra.mxu0 %v1635_v8  ;;  %1443 = vmatpush3.msra.mxu1 %v1635_v8  ;;  %v260_v17 = vsel %vm259_vm0, %v258_v15, 0  ;;  %v363_v38 = vsel %vm362_vm1, %v361_v16, 0  ;;  %v1809_v63 = vshll.u32 %v256_v49, 8  ;;  %v359_v14 = vor.u32 8388608, %v358_v59 }
  0x27   :  { %1409 = vmatprep.subr.mxu0 %v1635_v8  ;;  %1444 = vmatprep.subr.mxu1 %v1635_v8  ;;  %v262_v18 = vand.u32 31, %v260_v17  ;;  %v1729_v29 = vshrl.u32 %v260_v17, 5  ;;  %v365_v41 = vand.u32 31, %v363_v38  ;;  %v1803_v60 = vshrl.u32 %v363_v38, 5 }
  0x28   :  { %1410 = vmatpush3.msra.mxu0 %v1635_v8  ;;  %1445 = vmatpush3.msra.mxu1 %v1635_v8  ;;  %vm353_vm0 = vcmp.lt.s32.totalorder %v1674_v0, 0  ;;  %vm1930_vm1 = vcmp.le.f32.partialorder %v351_v48, 0.7853982 }
  0x29   :  { %1411 = vmatprep.subr.mxu0 %v1635_v8  ;;  %1446 = vmatprep.subr.mxu1 %v1635_v8  ;;  %v1719_v20 = vsub.s32 32, %v262_v18  ;;  %v265_v22 = vshll.u32 %v1636_v21, %v262_v18  ;;  %v268_v24 = vshll.u32 %v1637_v23, %v262_v18  ;;  %v271_v26 = vshll.u32 %v1638_v25, %v262_v18 }
  0x2a   :  { %1412 = vmatpush3.msra.mxu0 %v1635_v8  ;;  %1447 = vmatpush3.msra.mxu1 %v1635_v8  ;;  %v274_v28 = vshll.u32 %v1639_v27, %v262_v18  ;;  %v277_v35 = vshll.u32 %v1640_v33, %v262_v18  ;;  %vm283_vm2 = vcmp.lt.s32.totalorder %v1729_v29, 4  ;;  %vm280_vm3 = vcmp.lt.s32.totalorder %v1729_v29, 1 }
  0x2b   :  { %1413 = vmatprep.subr.mxu0 %v1635_v8  ;;  %1448 = vmatprep.subr.mxu1 %v1635_v8  ;;  %v266_v30 = vshrl.u32 %v1637_v23, %v1719_v20  ;;  %v269_v31 = vshrl.u32 %v1638_v25, %v1719_v20  ;;  %v272_v32 = vshrl.u32 %v1639_v27, %v1719_v20  ;;  %vm282_vm4 = vcmp.lt.s32.totalorder %v1729_v29, 3 }
  0x2c   :  { %1414 = vmatpush3.msra.mxu0 %v1635_v8  ;;  %1449 = vmatpush3.msra.mxu1 %v1635_v8  ;;  %v275_v34 = vshrl.u32 %v1640_v33, %v1719_v20  ;;  %v278_v37 = vshrl.u32 %v1641_v36, %v1719_v20  ;;  %v366_v52 = vsub.s32 32, %v365_v41  ;;  %v368_v55 = vshll.u32 %v1636_v21, %v365_v41 }
  0x2d   :  { %1415 = vmatprep.subr.mxu0 %v1635_v8  ;;  %1450 = vmatprep.subr.mxu1 %v1635_v8  ;;  %v1756_v43 = vor.u32 %v266_v30, %v265_v22  ;;  %v1758_v44 = vor.u32 %v269_v31, %v268_v24  ;;  %v1760_v45 = vor.u32 %v272_v32, %v271_v26  ;;  %vm281_vm5 = vcmp.lt.s32.totalorder %v1729_v29, 2 }
  0x2e   :  { %1416 = vmatpush3.msra.mxu0 %v1635_v8  ;;  %1451 = vmatpush3.msra.mxu1 %v1635_v8  ;;  %v276_v39 = vor.u32 %v275_v34, %v274_v28  ;;  %v279_v40 = vor.u32 %v278_v37, %v277_v35  ;;  %v369_v56 = vshrl.u32 %v1637_v23, %v366_v52  ;;  %vm383_vm6 = vcmp.lt.s32.totalorder %v1803_v60, 1 }
  0x2f   :  { %1417 = vmatprep.subr.mxu0 %v1635_v8  ;;  %1452 = vmatprep.subr.mxu1 %v1635_v8  ;;  %v288_v50 = vsel %vm280_vm3, %v1756_v43, %v1758_v44  ;;  %v292_v51 = vsel %vm280_vm3, %v1758_v44, %v1760_v45  ;;  %v371_v57 = vshll.u32 %v1637_v23, %v365_v41  ;;  %vm386_vm7 = vcmp.lt.s32.totalorder %v1803_v60, 4 }
  0x30   :  { %1418 = vmatpush3.msra.mxu0 %v1635_v8  ;;  %1453 = vmatpush3.msra.mxu1 %v1635_v8  ;;  %v289_v46 = vsel %vm283_vm2, %v276_v39, 920167782  ;;  %v293_v47 = vsel %vm283_vm2, %v279_v40, 1326507024  ;;  %v372_v58 = vshrl.u32 %v1638_v25, %v366_v52  ;;  %v377_v61 = vshll.u32 %v1639_v27, %v365_v41 }
  0x31   :  { %1419 = vmatprep.subr.mxu0 %v1635_v8  ;;  %1454 = vmatprep.subr.mxu1 %v1635_v8  ;;  %v290_v53 = vsel %vm282_vm4, %v1760_v45, %v289_v46  ;;  %v294_v54 = vsel %vm282_vm4, %v276_v39, %v293_v47  ;;  %v378_v62 = vshrl.u32 %v1640_v33, %v366_v52  ;;  %vm385_vm8 = vcmp.lt.s32.totalorder %v1803_v60, 3 }
  0x32   :  { %1420 = vmatpush3.msra.mxu0 %v1635_v8  ;;  %1455 = vmatpush3.msra.mxu1 %v1635_v8  ;;  %v374_v2 = vshll.u32 %v1638_v25, %v365_v41  ;;  %v375_v3 = vshrl.u32 %v1639_v27, %v366_v52  ;;  %v291_v4 = vsel %vm281_vm5, %v288_v50, %v290_v53  ;;  %v285_v26 = vsel %vm283_vm2, %v1760_v45, 2102212464 }
  0x33   :  { %1421 = vmatprep.subr.mxu0 %v1635_v8  ;;  %1456 = vmatprep.subr.mxu1 %v1635_v8  ;;  %v295_v5 = vsel %vm281_vm5, %v292_v51, %v294_v54  ;;  %v380_v6 = vshll.u32 %v1640_v33, %v365_v41  ;;  %v370_v7 = vor.u32 %v369_v56, %v368_v55  ;;  %vm384_vm9 = vcmp.lt.s32.totalorder %v1803_v60, 2 }
  0x34   :  { %1422 = vmatpush3.msra.mxu0 %v1635_v8  ;;  %1457 = vmatpush3.msra.mxu1 %v1635_v8  ;;  %v373_v9 = vor.u32 %v372_v58, %v371_v57  ;;  %v381_v10 = vshrl.u32 %v1641_v36, %v366_v52  ;;  %v264_v13 = vshrl.u32 %v1636_v21, %v1719_v20  ;;  %v399_v31 = vshll.u32 %v359_v14, 8 }
  0x35   :  { %1423 = vmatprep.subr.mxu0 %v1635_v8  ;;  %1458 = vmatprep.subr.mxu1 %v1635_v8  ;;  %v379_v15 = vor.u32 %v378_v62, %v377_v61  ;;  %v1831_v16 = vmul.u32.u64.low %v1809_v63, %v291_v4  ;;  %v1832_v17 = vmul.u32.u64.high %v1809_v63, %v291_v4, %v1831_v16  ;;  %v376_v18 = vor.u32 %v375_v3, %v374_v2 }
  0x36   :  { %1424 = vmatpush3.msra.mxu0 %v1635_v8  ;;  %1459 = vmatpush3.msra.mxu1 %v1635_v8  ;;  %v1839_v20 = vmul.u32.u64.low %v1809_v63, %v295_v5  ;;  %v1840_v22 = vmul.u32.u64.high %v1809_v63, %v295_v5, %v1839_v20  ;;  %v382_v24 = vor.u32 %v381_v10, %v380_v6  ;;  %v391_v28 = vsel %vm383_vm6, %v370_v7, %v373_v9 }
  0x37   :  { %1425 = vmatprep.subr.mxu0 %v1635_v8  ;;  %1460 = vmatprep.subr.mxu1 %v1635_v8  ;;  %v392_v30 = vsel %vm386_vm7, %v379_v15, 920167782  ;;  %v284_v32 = vsel %vm280_vm3, %v264_v13, %v1756_v43  ;;  %v367_v34 = vshrl.u32 %v1636_v21, %v366_v52  ;;  %v395_v37 = vsel %vm383_vm6, %v373_v9, %v376_v18 }
  0x38   :  { %1426 = vmatpush3.msra.mxu0 %v1635_v8  ;;  %1461 = vmatpush3.msra.mxu1 %v1635_v8  ;;  %v393_v35 = vsel %vm385_vm8, %v376_v18, %v392_v30  ;;  %v286_v38 = vsel %vm282_vm4, %v1758_v44, %v285_v26  ;;  %v388_v39 = vsel %vm386_vm7, %v376_v18, 2102212464  ;;  %v396_v41 = vsel %vm386_vm7, %v382_v24, 1326507024 }
  0x39   :  { %1427 = vmatprep.subr.mxu0 %v1635_v8  ;;  %1462 = vmatprep.subr.mxu1 %v1635_v8  ;;  %v394_v40 = vsel %vm384_vm9, %v391_v28, %v393_v35  ;;  %v397_v42 = vsel %vm385_vm8, %v379_v15, %v396_v41  ;;  %v287_v44 = vsel %vm281_vm5, %v284_v32, %v286_v38  ;;  %v306_v47 = vadd.s32 1, %v1832_v17 }
  0x3a   :  { %1428 = vmatpush3.msra.mxu0 %v1635_v8  ;;  %1463 = vmatpush3.msra.mxu1 %v1635_v8  ;;  %v398_v43 = vsel %vm384_vm9, %v395_v37, %v397_v42  ;;  %v1876_v45 = vmul.u32.u64.low %v399_v31, %v394_v40  ;;  %v1877_v46 = vmul.u32.u64.high %v399_v31, %v394_v40, %v1876_v45  ;;  %v387_v49 = vsel %vm383_vm6, %v367_v34, %v370_v7 }
  0x3b   :  { %1429 = vmatprep.subr.mxu0 %v1635_v8  ;;  %1464 = vmatprep.subr.mxu1 %v1635_v8  ;;  %v389_v50 = vsel %vm385_vm8, %v373_v9, %v388_v39  ;;  %vm305_vm10 = vc.u32 %v1840_v22, %v1831_v16  ;;  %v1888_v51 = vmul.u32.u64.low %v399_v31, %v398_v43  ;;  %v1889_v52 = vmul.u32.u64.high %v399_v31, %v398_v43, %v1888_v51 }
  0x3c   :  { %1430 = vmatpush3.msra.mxu0 %v1635_v8  ;;  %1465 = vmatpush3.msra.mxu1 %v1635_v8  ;;  %v303_v53 = vmul.u32 %v1809_v63, %v287_v44  ;;  %v390_v29 = vsel %vm384_vm9, %v387_v49, %v389_v50  ;;  %v409_v54 = vadd.s32 1, %v1877_v46  ;;  %v307_v55 = vsel %vm305_vm10, %v306_v47, %v1832_v17 }
  0x3d   :  { %1431 = vmatprep.subr.mxu0 %v1635_v8  ;;  %1466 = vmatprep.subr.mxu1 %v1635_v8  ;;  %v406_v56 = vmul.u32 %v399_v31, %v390_v29  ;;  %vm408_vm11 = vc.u32 %v1889_v52, %v1876_v45  ;;  %v304_v28 = vadd.s32 %v1831_v16, %v1840_v22 }
  0x3e   :  { %1432 = vmatpush3.msra.mxu0 %v1635_v8  ;;  %1467 = vmatpush3.msra.mxu1 %v1635_v8  ;;  %v308_v57 = vadd.s32 %v307_v55, %v303_v53  ;;  %v410_v58 = vsel %vm408_vm11, %v409_v54, %v1877_v46  ;;  %v407_v32 = vadd.s32 %v1876_v45, %v1889_v52 }
  0x3f   :  { %1471 = vmatprep.subr.mxu0 %v1635_v8  ;;  %1506 = vmatprep.subr.mxu1 %v1635_v8  ;;  %v411_v59 = vadd.s32 %v410_v58, %v406_v56  ;;  %v84_v58 = vmul.f32 %v1696_v12, %v1676_v1 }
  0x40   :  { %v309_v61 = vadd.s32 536870912, %v308_v57 }
  0x41   :  { %v412_v62 = vadd.s32 536870912, %v411_v59 }
  0x42   :  { %v1898_v2 = vshrl.u32 %v309_v61, 30 }
  0x43   :  { %v1900_v3 = vshrl.u32 %v412_v62, 30 }
  0x44   :  { %v311_v60 = vshll.u32 %v1898_v2, 30 }
  0x45   :  { %v414_v63 = vshll.u32 %v1900_v3, 30 }
  0x46   :  { %v312_v4 = vsub.s32 %v308_v57, %v311_v60  ;;  %v78_v57 = vmul.f32 %v1696_v12, %v1696_v12 }
  0x47   :  { %v415_v5 = vsub.s32 %v411_v59, %v414_v63  ;;  %v79_v59 = vmul.f32 %v1694_v11, %v1694_v11 }
  0x48   :  { %v314_v6 = vsub.s32 0, %v312_v4 }
  0x49   :  { %v417_v7 = vsub.s32 0, %v415_v5 }
  0x4a   :  { %v1297_v9 = vmin.u32 %v314_v6, %v312_v4 }
  0x4b   :  { %v1301_v10 = vmin.u32 %v417_v7, %v415_v5 }
  0x4c   :  { %v316_v13 = vclz %v1297_v9 }
  0x4d   :  { %v419_v14 = vclz %v1301_v10 }
  0x4e   :  { %v1298_v15 = vadd.s32 4294967294, %v316_v13 }
  0x4f   :  { %v1302_v17 = vadd.s32 4294967294, %v419_v14 }
  0x50   :  { %vm1299_vm12 = vcmp.lt.s32.totalorder %v1298_v15, 0 }
  0x51   :  { %v319_v18 = vsel %vm1299_vm12, 0, %v1298_v15  ;;  %vm1303_vm13 = vcmp.lt.s32.totalorder %v1302_v17, 0 }
  0x52   :  { %v324_v20 = vsub.s32 4294967266, %v319_v18  ;;  %v422_v24 = vsel %vm1303_vm13, 0, %v1302_v17  ;;  %v320_v30 = vsub.s32 32, %v319_v18  ;;  %v321_v37 = vshll.u32 %v312_v4, %v319_v18 }
  0x53   :  { %v427_v26 = vsub.s32 4294967266, %v422_v24  ;;  %v423_v34 = vsub.s32 32, %v422_v24  ;;  %v424_v40 = vshll.u32 %v415_v5, %v422_v24 }
  0x54   :  { %v325_v31 = vadd.s32 127, %v324_v20  ;;  %v322_v38 = vshrl.u32 %v304_v28, %v320_v30  ;;  %v437_v28 = vsub.s32 4, %v1900_v3 }
  0x55   :  { %v428_v35 = vadd.s32 127, %v427_v26  ;;  %v425_v41 = vshrl.u32 %v407_v32, %v423_v34  ;;  %v334_v26 = vsub.s32 4, %v1898_v2  ;;  %v243_v34 = vsub.f32 0.0, %v1694_v11 }
  0x56   :  { %v326_v39 = vshll.u32 %v325_v31, 23  ;;  %v323_v43 = vor.u32 %v322_v38, %v321_v37  ;;  %v242_v31 = vsub.f32 0.0, %v1696_v12  ;;  %v438_v32 = vsel %vm353_vm0, %v437_v28, %v1900_v3 }
  0x57   :  { %v429_v42 = vshll.u32 %v428_v35, 23  ;;  %v426_v44 = vor.u32 %v425_v41, %v424_v40  ;;  %v335_v30 = vsel %vm250_vm14, %v334_v26, %v1898_v2 }
  0x58   :  { %v327_v46 = vor.u32 4788187, %v326_v39  ;;  %v330_v50 = vcvt.s32.f32 %v323_v43  ;;  %v337_v2 = vsel %vm1910_vm15, 0, %v335_v30  ;;  %v244_v3 = vmul.f32 1.442695, %v242_v31 }
  0x59   :  { %v430_v47 = vor.u32 4788187, %v429_v42  ;;  %v433_v16 = vcvt.s32.f32 %v426_v44  ;;  %v549_v35 = vadd.s32 3, %v337_v2  ;;  %v341_v40 = vand.u32 3, %v337_v2 }
  0x5a   :  { %v328_v49 = vand.u32 2147483647, %v327_v46 }
  0x5b   :  { %v431_v51 = vand.u32 2147483647, %v430_v47  ;;  %v550_v42 = vand.u32 3, %v549_v35  ;;  %vm343_vm2 = vcmp.eq.s32.totalorder %v341_v40, 0  ;;  %vm346_vm3 = vcmp.eq.s32.totalorder %v341_v40, 2 }
  0x5c   :  { %v331_v22 = vmul.f32 %v330_v50, %v328_v49  ;;  %vm342_vm10 = vcmp.lt.s32.totalorder %v341_v40, 2 }
  0x5d   :  { %v434_v53 = vmul.f32 %v433_v16, %v431_v51  ;;  %vm552_vm4 = vcmp.eq.s32.totalorder %v550_v42, 0  ;;  %vm555_vm5 = vcmp.eq.s32.totalorder %v550_v42, 2  ;;  %vm551_vm11 = vcmp.lt.s32.totalorder %v550_v42, 2 }
  0x5e   :  { %v332_v29 = vxor.u32 2147483648, %v331_v22 }
  0x5f   :  { %v435_v54 = vxor.u32 2147483648, %v434_v53 }
  0x60   :  { %v333_v56 = vsel %vm250_vm14, %v332_v29, %v331_v22  ;;  %vm340_vm14 = vweird.f32 %v1676_v1 }
  0x61   :  { %v336_v60 = vsel %vm1910_vm15, %v1676_v1, %v333_v56  ;;  %v436_v4 = vsel %vm353_vm0, %v435_v54, %v434_v53  ;;  %vm443_vm15 = vweird.f32 %v1674_v0 }
  0x62   :  { %1570 = vcosq.f32 %v336_v60  ;;  %v439_v48 = vsel %vm1930_vm1, %v1674_v0, %v436_v4 }
  0x63   :  { %1572 = vsinq.f32 %v336_v60 }
  0x64   :  { %1574 = vcosq.f32 %v439_v48 }
  0x65   :  { %1576 = vsinq.f32 %v439_v48 }
  0x66   :  { %1578 = vpow2.f32 %v244_v3 }
  0x6f   :  { %v1571_v37 = vpop.eup %1570 }
  0x70   :  { %v1573_v39 = vpop.eup %1572  ;;  %v347_v49 = vxor.u32 2147483648, %v1571_v37 }
  0x71   :  { %v1575_v41 = vpop.eup %1574  ;;  %v344_v47 = vxor.u32 2147483648, %v1573_v39 }
  0x72   :  { %v1577_v46 = vpop.eup %1576  ;;  %v450_v50 = vxor.u32 2147483648, %v1575_v41  ;;  %v348_v22 = vsel %vm346_vm3, %v347_v49, %v1573_v39  ;;  %v557_v29 = vsel %vm555_vm5, %v347_v49, %v1573_v39 }
  0x73   :  { %v447_v51 = vxor.u32 2147483648, %v1577_v46  ;;  %v345_v16 = vsel %vm343_vm2, %v1571_v37, %v344_v47  ;;  %v554_v53 = vsel %vm552_vm4, %v1571_v37, %v344_v47 }
  0x74   :  { %v349_v56 = vsel %vm342_vm10, %v345_v16, %v348_v22 }
  0x8f   :  { %v67_v45 = vpop.permute.xlu1 %66  ;;  %v65_v52 = vpop.permute.xlu0 %64 }
  0x90   :  { %v69_v5 = vsub.f32 %v67_v45, %v1674_v0  ;;  %v68_v6 = vsub.f32 %v65_v52, %v1676_v1 }
  0x95   :  { %v73_v61 = vpop.permute.xlu1 %72  ;;  %v71_v62 = vpop.permute.xlu0 %70 }
  0x96   :  { %v75_v7 = vsub.f32 %v73_v61, %v1694_v11  ;;  %v74_v9 = vsub.f32 %v71_v62, %v1696_v12  ;;  %v440_v12 = vsel %vm1930_vm1, 0, %v438_v32  ;;  %v246_v11 = vmul.f32 1.442695, %v243_v34  ;;  %v1579_v61 = vpop.eup %1578 }
  0x97   :  { %v653_v38 = vadd.s32 3, %v440_v12  ;;  %v444_v43 = vand.u32 3, %v440_v12  ;;  %v350_v62 = vsel %vm340_vm14, nan, %v349_v56 }
  0x98   :  { %v77_v10 = vmul.f32 %v75_v7, %v75_v7  ;;  %v83_v13 = vmul.f32 %v75_v7, %v69_v5  ;;  %v76_v14 = vmul.f32 %v74_v9, %v74_v9  ;;  %v82_v15 = vmul.f32 %v74_v9, %v68_v6 }
  0x99   :  { %1580 = vpow2.f32 %v246_v11  ;;  %v654_v44 = vand.u32 3, %v653_v38  ;;  %vm449_vm6 = vcmp.eq.s32.totalorder %v444_v43, 2  ;;  %vm446_vm7 = vcmp.eq.s32.totalorder %v444_v43, 0 }
  0x9a   :  { %v80_v17 = vadd.f32 %v78_v57, %v76_v14  ;;  %v86_v18 = vadd.f32 %v84_v58, %v82_v15  ;;  %v81_v20 = vadd.f32 %v79_v59, %v77_v10  ;;  %v87_v24 = vadd.f32 %v85_v19, %v83_v13 }
  0x9b   :  { %vm656_vm8 = vcmp.eq.s32.totalorder %v654_v44, 0  ;;  %vm659_vm9 = vcmp.eq.s32.totalorder %v654_v44, 2  ;;  %vm445_vm12 = vcmp.lt.s32.totalorder %v444_v43, 2  ;;  %v451_v45 = vsel %vm449_vm6, %v450_v50, %v1577_v46 }
  0x9c   :  { %1433 = vmatprep.mubr.f32.mxu0 %v80_v17  ;;  %1468 = vmatprep.mubr.f32.mxu1 %v86_v18  ;;  %v448_v52 = vsel %vm446_vm7, %v1575_v41, %v447_v51  ;;  %vm655_vm13 = vcmp.lt.s32.totalorder %v654_v44, 2  ;;  %v658_v54 = vsel %vm656_vm8, %v1575_v41, %v447_v51  ;;  %v661_v55 = vsel %vm659_vm9, %v450_v50, %v1577_v46 }
  0x9d   :  { %1434 = vmatmul.mubr.f32.vlgmr.msra.gmra.mxu0 %v81_v20  ;;  %1469 = vmatmul.mubr.f32.vlgmr.msra.gmra.mxu1 %v87_v24  ;;  %v558_v57 = vsel %vm551_vm11, %v554_v53, %v557_v29  ;;  %v452_v58 = vsel %vm445_vm12, %v448_v52, %v451_v45  ;;  %v662_v59 = vsel %vm655_vm13, %v658_v54, %v661_v55 }
  0x9e   :  { %1472 = vmatpush3.msra.mxu0 %v1635_v8  ;;  %1507 = vmatpush3.msra.mxu1 %v1635_v8  ;;  %v559_v19 = vsel %vm340_vm14, nan, %v558_v57  ;;  %v453_v0 = vsel %vm443_vm15, nan, %v452_v58  ;;  %v663_v63 = vsel %vm443_vm15, nan, %v662_v59  ;;  %v454_v4 = vmul.f32 %v1579_v61, %v350_v62 }
  0x9f   :  { %1473 = vmatprep.subr.mxu0 %v1635_v8  ;;  %1508 = vmatprep.subr.mxu1 %v1635_v8  ;;  %v664_v5 = vmul.f32 %v1579_v61, %v559_v19 }
  0xa0   :  { %1474 = vmatpush3.msra.mxu0 %v1635_v8  ;;  %1509 = vmatpush3.msra.mxu1 %v1635_v8 }
  0xa1   :  { %1475 = vmatprep.subr.mxu0 %v1635_v8  ;;  %1510 = vmatprep.subr.mxu1 %v1635_v8 }
  0xa2   :  { %1476 = vmatpush3.msra.mxu0 %v1635_v8  ;;  %1511 = vmatpush3.msra.mxu1 %v1635_v8 }
  0xa3   :  { %1477 = vmatprep.subr.mxu0 %v1635_v8  ;;  %1512 = vmatprep.subr.mxu1 %v1635_v8 }
  0xa4   :  { %1478 = vmatpush3.msra.mxu0 %v1635_v8  ;;  %1513 = vmatpush3.msra.mxu1 %v1635_v8 }
  0xa5   :  { %1479 = vmatprep.subr.mxu0 %v1635_v8  ;;  %1514 = vmatprep.subr.mxu1 %v1635_v8 }
  0xa6   :  { %1480 = vmatpush3.msra.mxu0 %v1635_v8  ;;  %1515 = vmatpush3.msra.mxu1 %v1635_v8  ;;  %v1581_v60 = vpop.eup %1580 }
  0xa7   :  { %1481 = vmatprep.subr.mxu0 %v1635_v8  ;;  %1516 = vmatprep.subr.mxu1 %v1635_v8  ;;  %v455_v1 = vmul.f32 %v1581_v60, %v453_v0  ;;  %v665_v6 = vmul.f32 %v1581_v60, %v663_v63 }
  0xa8   :  { %1482 = vmatpush3.msra.mxu0 %v1635_v8  ;;  %1517 = vmatpush3.msra.mxu1 %v1635_v8 }
  0xa9   :  { %1483 = vmatprep.subr.mxu0 %v1635_v8  ;;  %1518 = vmatprep.subr.mxu1 %v1635_v8 }
  0xaa   :  { %1484 = vmatpush3.msra.mxu0 %v1635_v8  ;;  %1519 = vmatpush3.msra.mxu1 %v1635_v8 }
  0xab   :  { %1485 = vmatprep.subr.mxu0 %v1635_v8  ;;  %1520 = vmatprep.subr.mxu1 %v1635_v8 }
  0xac   :  { %1486 = vmatpush3.msra.mxu0 %v1635_v8  ;;  %1521 = vmatpush3.msra.mxu1 %v1635_v8 }
  0xad   :  { %1487 = vmatprep.subr.mxu0 %v1635_v8  ;;  %1522 = vmatprep.subr.mxu1 %v1635_v8 }
  0xae   :  { %1488 = vmatpush3.msra.mxu0 %v1635_v8  ;;  %1523 = vmatpush3.msra.mxu1 %v1635_v8 }
  0xaf   :  { %1489 = vmatprep.subr.mxu0 %v1635_v8  ;;  %1524 = vmatprep.subr.mxu1 %v1635_v8 }
  0xb0   :  { %1490 = vmatpush3.msra.mxu0 %v1635_v8  ;;  %1525 = vmatpush3.msra.mxu1 %v1635_v8 }
  0xb1   :  { %1491 = vmatprep.subr.mxu0 %v1635_v8  ;;  %1526 = vmatprep.subr.mxu1 %v1635_v8 }
  0xb2   :  { %1492 = vmatpush3.msra.mxu0 %v1635_v8  ;;  %1527 = vmatpush3.msra.mxu1 %v1635_v8 }
  0xb3   :  { %1493 = vmatprep.subr.mxu0 %v1635_v8  ;;  %1528 = vmatprep.subr.mxu1 %v1635_v8 }
  0xb4   :  { %1494 = vmatpush3.msra.mxu0 %v1635_v8  ;;  %1529 = vmatpush3.msra.mxu1 %v1635_v8 }
  0xb5   :  { %1495 = vmatprep.subr.mxu0 %v1635_v8  ;;  %1530 = vmatprep.subr.mxu1 %v1635_v8 }
  0xb6   :  { %1496 = vmatpush3.msra.mxu0 %v1635_v8  ;;  %1531 = vmatpush3.msra.mxu1 %v1635_v8 }
  0xb7   :  { %1497 = vmatprep.subr.mxu0 %v1635_v8  ;;  %1532 = vmatprep.subr.mxu1 %v1635_v8 }
  0xb8   :  { %1498 = vmatpush3.msra.mxu0 %v1635_v8  ;;  %1533 = vmatpush3.msra.mxu1 %v1635_v8 }
  0xb9   :  { %1499 = vmatprep.subr.mxu0 %v1635_v8  ;;  %1534 = vmatprep.subr.mxu1 %v1635_v8 }
  0xba   :  { %1500 = vmatpush3.msra.mxu0 %v1635_v8  ;;  %1535 = vmatpush3.msra.mxu1 %v1635_v8 }
  0xbb   :  { %1501 = vmatprep.subr.mxu0 %v1635_v8  ;;  %1536 = vmatprep.subr.mxu1 %v1635_v8 }
  0xbc   :  { %1502 = vmatpush3.msra.mxu0 %v1635_v8  ;;  %1503 = vmatprep.mubr.f32.mxu0 %v454_v4 }
  0xbd   :  { %1537 = vmatpush3.msra.mxu1 %v1635_v8  ;;  %1538 = vmatprep.mubr.f32.mxu1 %v664_v5 }
  0xbe   :  { %1504 = vmatmul.mubr.f32.vlgmr.msra.gmra.mxu0 %v455_v1  ;;  %1539 = vmatmul.mubr.f32.vlgmr.msra.gmra.mxu1 %v665_v6 }
 0x15d   :  { %v1470_v7 = vpop.f32.mrf.mxu1 }
 0x15e   :  { %v2036_v9 = vmul.f32 0.5, %v1470_v7 }
 0x15f   :  { %v231_v10 = vpop.f32.mrf.mxu1 }
 0x160   :  { %v929_v13 = vand.u32 2147483647, %v2036_v9  ;;  %v932_v14 = vand.u32 2139095040, %v2036_v9  ;;  %v2040_v15 = vmul.f32 0.5, %v231_v10  ;;  %vm931_vm14 = vcmp.lt.s32.totalorder %v2036_v9, 0 }
 0x162   :  { %v933_v48 = vshrl.u32 %v932_v14, 23  ;;  %v936_v18 = vand.u32 8388607, %v929_v13  ;;  %v829_v8 = vand.u32 2139095040, %v2040_v15  ;;  %v826_v26 = vand.u32 2147483647, %v2040_v15 }
 0x163   :  { %vm930_vm15 = vcmp.le.f32.partialorder %v929_v13, 0.7853982 }
 0x164   :  { %v1316_v17 = vadd.s32 4294967169, %v933_v48  ;;  %v830_v24 = vshrl.u32 %v829_v8, 23  ;;  %v937_v28 = vor.u32 8388608, %v936_v18  ;;  %v833_v34 = vand.u32 8388607, %v826_v26 }
 0x166   :  { %v939_v20 = vadd.s32 1, %v1316_v17  ;;  %v1312_v30 = vadd.s32 4294967169, %v830_v24  ;;  %v2049_v35 = vshll.u32 %v937_v28, 8  ;;  %v834_v58 = vor.u32 8388608, %v833_v34 }
 0x168   :  { %vm940_vm0 = vcmp.gt.s32.totalorder %v939_v20, 0  ;;  %v836_v37 = vadd.s32 1, %v1312_v30  ;;  %v874_v10 = vshll.u32 %v834_v58, 8 }
 0x169   :  { %v941_v31 = vsel %vm940_vm0, %v939_v20, 0  ;;  %vm828_vm0 = vcmp.lt.s32.totalorder %v2040_v15, 0 }
 0x16a   :  { %v942_v32 = vshrl.u32 %v941_v31, 5  ;;  %v943_v2 = vand.u32 31, %v941_v31  ;;  %vm837_vm3 = vcmp.gt.s32.totalorder %v836_v37, 0 }
 0x16b   :  { %v838_v53 = vsel %vm837_vm3, %v836_v37, 0 }
 0x16c   :  { %v944_v12 = vsub.s32 32, %v943_v2  ;;  %v946_v3 = vshll.u32 %v1636_v21, %v943_v2  ;;  %v949_v11 = vshll.u32 %v1637_v23, %v943_v2  ;;  %v952_v38 = vshll.u32 %v1638_v25, %v943_v2 }
 0x16d   :  { %v955_v39 = vshll.u32 %v1639_v27, %v943_v2  ;;  %v958_v40 = vshll.u32 %v1640_v33, %v943_v2  ;;  %vm961_vm1 = vcmp.lt.s32.totalorder %v942_v32, 1  ;;  %vm963_vm2 = vcmp.lt.s32.totalorder %v942_v32, 3 }
 0x16e   :  { %v947_v41 = vshrl.u32 %v1637_v23, %v944_v12  ;;  %v950_v42 = vshrl.u32 %v1638_v25, %v944_v12  ;;  %v953_v43 = vshrl.u32 %v1639_v27, %v944_v12  ;;  %v945_v46 = vshrl.u32 %v1636_v21, %v944_v12 }
 0x16f   :  { %v956_v44 = vshrl.u32 %v1640_v33, %v944_v12  ;;  %v959_v47 = vshrl.u32 %v1641_v36, %v944_v12  ;;  %vm964_vm4 = vcmp.lt.s32.totalorder %v942_v32, 4  ;;  %vm962_vm5 = vcmp.lt.s32.totalorder %v942_v32, 2 }
 0x170   :  { %v948_v49 = vor.u32 %v947_v41, %v946_v3  ;;  %v951_v50 = vor.u32 %v950_v42, %v949_v11  ;;  %v954_v51 = vor.u32 %v953_v43, %v952_v38  ;;  %v840_v62 = vand.u32 31, %v838_v53 }
 0x171   :  { %v957_v16 = vor.u32 %v956_v44, %v955_v39  ;;  %v960_v22 = vor.u32 %v959_v47, %v958_v40  ;;  %v839_v6 = vshrl.u32 %v838_v53, 5 }
 0x172   :  { %v965_v29 = vsel %vm961_vm1, %v945_v46, %v948_v49  ;;  %v966_v45 = vsel %vm964_vm4, %v954_v51, 2102212464  ;;  %v969_v52 = vsel %vm961_vm1, %v948_v49, %v951_v50  ;;  %v973_v54 = vsel %vm961_vm1, %v951_v50, %v954_v51 }
 0x173   :  { %v967_v55 = vsel %vm963_vm2, %v951_v50, %v966_v45  ;;  %v970_v56 = vsel %vm964_vm4, %v957_v16, 920167782  ;;  %v974_v57 = vsel %vm964_vm4, %v960_v22, 1326507024  ;;  %v841_v7 = vsub.s32 32, %v840_v62 }
 0x174   :  { %v971_v59 = vsel %vm963_vm2, %v954_v51, %v970_v56  ;;  %v975_v61 = vsel %vm963_vm2, %v957_v16, %v974_v57  ;;  %v968_v19 = vsel %vm962_vm5, %v965_v29, %v967_v55  ;;  %v843_v48 = vshll.u32 %v1636_v21, %v840_v62 }
 0x175   :  { %v972_v60 = vsel %vm962_vm5, %v969_v52, %v971_v59  ;;  %v976_v0 = vsel %vm962_vm5, %v973_v54, %v975_v61  ;;  %v984_v14 = vmul.u32 %v2049_v35, %v968_v19  ;;  %v846_v17 = vshll.u32 %v1637_v23, %v840_v62 }
 0x176   :  { %v2068_v63 = vmul.u32.u64.low %v2049_v35, %v976_v0  ;;  %v2069_v4 = vmul.u32.u64.high %v2049_v35, %v976_v0, %v2068_v63  ;;  %v2072_v5 = vmul.u32.u64.low %v2049_v35, %v972_v60  ;;  %v2073_v1 = vmul.u32.u64.high %v2049_v35, %v972_v60, %v2072_v5  ;;  %v1435_v60 = vpop.f32.mrf.mxu0 }
 0x177   :  { %v849_v18 = vshll.u32 %v1638_v25, %v840_v62  ;;  %v844_v8 = vshrl.u32 %v1637_v23, %v841_v7  ;;  %v847_v20 = vshrl.u32 %v1638_v25, %v841_v7  ;;  %v850_v24 = vshrl.u32 %v1639_v27, %v841_v7 }
 0x178   :  { %v852_v28 = vshll.u32 %v1639_v27, %v840_v62  ;;  %vm986_vm6 = vc.u32 %v2069_v4, %v2072_v5  ;;  %v987_v30 = vadd.s32 1, %v2073_v1  ;;  %v853_v31 = vshrl.u32 %v1640_v33, %v841_v7 }
 0x179   :  { %v855_v32 = vshll.u32 %v1640_v33, %v840_v62  ;;  %v845_v2 = vor.u32 %v844_v8, %v843_v48  ;;  %v848_v34 = vor.u32 %v847_v20, %v846_v17  ;;  %v851_v12 = vor.u32 %v850_v24, %v849_v18 }
 0x17a   :  { %v856_v23 = vshrl.u32 %v1641_v36, %v841_v7  ;;  %v988_v25 = vsel %vm986_vm6, %v987_v30, %v2073_v1  ;;  %v854_v3 = vor.u32 %v853_v31, %v852_v28  ;;  %vm858_vm7 = vcmp.lt.s32.totalorder %v839_v6, 1 }
 0x17b   :  { %vm861_vm8 = vcmp.lt.s32.totalorder %v839_v6, 4  ;;  %v989_v27 = vadd.s32 %v988_v25, %v984_v14  ;;  %vm860_vm9 = vcmp.lt.s32.totalorder %v839_v6, 3  ;;  %v842_v11 = vshrl.u32 %v1636_v21, %v841_v7 }
 0x17c   :  { %v857_v35 = vor.u32 %v856_v23, %v855_v32  ;;  %v863_v37 = vsel %vm861_vm8, %v851_v12, 2102212464  ;;  %v866_v38 = vsel %vm858_vm7, %v845_v2, %v848_v34  ;;  %v867_v39 = vsel %vm861_vm8, %v854_v3, 920167782 }
 0x17d   :  { %v870_v40 = vsel %vm858_vm7, %v848_v34, %v851_v12  ;;  %v990_v33 = vadd.s32 536870912, %v989_v27  ;;  %vm859_vm10 = vcmp.lt.s32.totalorder %v839_v6, 2  ;;  %v868_v41 = vsel %vm860_vm9, %v851_v12, %v867_v39 }
 0x17e   :  { %v871_v42 = vsel %vm861_vm8, %v857_v35, 1326507024  ;;  %v862_v43 = vsel %vm858_vm7, %v842_v11, %v845_v2  ;;  %v864_v36 = vsel %vm860_vm9, %v848_v34, %v863_v37  ;;  %v869_v46 = vsel %vm859_vm10, %v866_v38, %v868_v41 }
 0x17f   :  { %v872_v44 = vsel %vm860_vm9, %v854_v3, %v871_v42  ;;  %v2092_v47 = vshrl.u32 %v990_v33, 30  ;;  %v2094_v50 = vmul.u32.u64.low %v874_v10, %v869_v46  ;;  %v2095_v51 = vmul.u32.u64.high %v874_v10, %v869_v46, %v2094_v50 }
 0x180   :  { %v873_v49 = vsel %vm859_vm10, %v870_v40, %v872_v44  ;;  %v865_v53 = vsel %vm859_vm10, %v862_v43, %v864_v36  ;;  %v985_v1 = vadd.s32 %v2072_v5, %v2069_v4  ;;  %v164_v14 = vmul.f32 -0.25, %v1435_v60  ;;  %v154_v40 = vpop.f32.mrf.mxu0 }
 0x181   :  { %v2097_v16 = vmul.u32.u64.low %v874_v10, %v873_v49  ;;  %v2098_v22 = vmul.u32.u64.high %v874_v10, %v873_v49, %v2097_v16  ;;  %v992_v21 = vshll.u32 %v2092_v47, 30  ;;  %v884_v45 = vadd.s32 1, %v2095_v51 }
 0x182   :  { %v881_v52 = vmul.u32 %v874_v10, %v865_v53  ;;  %v821_v30 = vsub.f32 0.0, %v164_v14  ;;  %v1015_v38 = vsub.s32 4, %v2092_v47  ;;  %v163_v43 = vmul.f32 -0.25, %v154_v40 }
 0x183   :  { %v993_v29 = vsub.s32 %v989_v27, %v992_v21  ;;  %vm883_vm11 = vc.u32 %v2098_v22, %v2094_v50  ;;  %v882_v5 = vadd.s32 %v2094_v50, %v2098_v22  ;;  %vm2124_vm1 = vcmp.le.f32.partialorder %v826_v26, 0.7853982 }
 0x184   :  { %v885_v55 = vsel %vm883_vm11, %v884_v45, %v2095_v51  ;;  %v824_v12 = vmul.f32 1.442695, %v821_v30  ;;  %v1016_v46 = vsel %vm931_vm14, %v1015_v38, %v2092_v47  ;;  %v820_v13 = vsub.f32 0.0, %v163_v43 }
 0x185   :  { %v995_v54 = vsub.s32 0, %v993_v29  ;;  %v886_v56 = vadd.s32 %v885_v55, %v881_v52  ;;  %v1018_v50 = vsel %vm930_vm15, 0, %v1016_v46  ;;  %vm1021_vm2 = vweird.f32 %v2036_v9 }
 0x186   :  { %1582 = vpow2.f32 %v824_v12  ;;  %v1233_v22 = vadd.s32 3, %v1018_v50  ;;  %v822_v53 = vmul.f32 1.442695, %v820_v13  ;;  %v1260_v12 = vstv %s2133_s1 }
 0x187   :  { %v1317_v57 = vmin.u32 %v995_v54, %v993_v29  ;;  %v887_v58 = vadd.s32 536870912, %v886_v56  ;;  %v1022_v54 = vand.u32 3, %v1018_v50  ;;  %vm918_vm9 = vweird.f32 %v2040_v15 }
 0x188   :  { %v1234_v55 = vand.u32 3, %v1233_v22 }
 0x189   :  { %v997_v59 = vclz %v1317_v57  ;;  %v2104_v61 = vshrl.u32 %v887_v58, 30  ;;  %vm1023_vm3 = vcmp.lt.s32.totalorder %v1022_v54, 2  ;;  %vm1027_vm4 = vcmp.eq.s32.totalorder %v1022_v54, 2 }
 0x18a   :  { %vm1239_vm5 = vcmp.eq.s32.totalorder %v1234_v55, 2  ;;  %vm1024_vm6 = vcmp.eq.s32.totalorder %v1022_v54, 0  ;;  %vm1236_vm7 = vcmp.eq.s32.totalorder %v1234_v55, 0  ;;  %vm1235_vm8 = vcmp.lt.s32.totalorder %v1234_v55, 2 }
 0x18b   :  { %v1318_v62 = vadd.s32 4294967294, %v997_v59  ;;  %v889_v19 = vshll.u32 %v2104_v61, 30  ;;  %v912_v21 = vsub.s32 4, %v2104_v61 }
 0x18d   :  { %vm1319_vm12 = vcmp.lt.s32.totalorder %v1318_v62, 0  ;;  %v890_v63 = vsub.s32 %v886_v56, %v889_v19  ;;  %v913_v56 = vsel %vm828_vm0, %v912_v21, %v2104_v61 }
 0x18e   :  { %v1000_v0 = vsel %vm1319_vm12, 0, %v1318_v62  ;;  %v915_v62 = vsel %vm2124_vm1, 0, %v913_v56 }
 0x18f   :  { %v1001_v6 = vsub.s32 32, %v1000_v0  ;;  %v1005_v7 = vsub.s32 4294967266, %v1000_v0  ;;  %v892_v10 = vsub.s32 0, %v890_v63  ;;  %v1002_v48 = vshll.u32 %v993_v29, %v1000_v0  ;;  %v1505_v0 = vpop.f32.mrf.mxu0 }
 0x191   :  { %v1003_v17 = vshrl.u32 %v985_v1, %v1001_v6  ;;  %v1006_v18 = vadd.s32 127, %v1005_v7  ;;  %v1313_v8 = vmin.u32 %v892_v10, %v890_v63  ;;  %v1540_v6 = vpop.f32.mrf.mxu1  ;;  %v1129_v7 = vadd.s32 3, %v915_v62 }
 0x192   :  { %v742_v10 = vmul.f32 0.0078125, %v1505_v0 }
 0x193   :  { %v1004_v20 = vor.u32 %v1003_v17, %v1002_v48  ;;  %v1007_v24 = vshll.u32 %v1006_v18, 23  ;;  %v894_v28 = vclz %v1313_v8  ;;  %v1583_v52 = vpop.eup %1582  ;;  %v819_v17 = vmul.f32 0.0078125, %v1540_v6 }
 0x194   :  { %v1035_v59 = vsub.f32 0.0, %v1583_v52  ;;  %v1130_v30 = vand.u32 3, %v1129_v7 }
 0x195   :  { %v1008_v31 = vor.u32 4788187, %v1007_v24  ;;  %v1314_v32 = vadd.s32 4294967294, %v894_v28  ;;  %v1011_v34 = vcvt.s32.f32 %v1004_v20  ;;  %v919_v28 = vand.u32 3, %v915_v62 }
 0x197   :  { %v1009_v2 = vand.u32 2147483647, %v1008_v31  ;;  %vm1315_vm13 = vcmp.lt.s32.totalorder %v1314_v32, 0  ;;  %vm920_vm10 = vcmp.lt.s32.totalorder %v919_v28, 2  ;;  %vm921_vm11 = vcmp.eq.s32.totalorder %v919_v28, 0 }
 0x198   :  { %v897_v4 = vsel %vm1315_vm13, 0, %v1314_v32  ;;  %vm924_vm12 = vcmp.eq.s32.totalorder %v919_v28, 2  ;;  %vm1135_vm13 = vcmp.eq.s32.totalorder %v1130_v30, 2 }
 0x199   :  { %v1012_v23 = vmul.f32 %v1011_v34, %v1009_v2  ;;  %v898_v25 = vsub.s32 32, %v897_v4  ;;  %v902_v3 = vsub.s32 4294967266, %v897_v4  ;;  %v899_v35 = vshll.u32 %v890_v63, %v897_v4 }
 0x19b   :  { %v1013_v27 = vxor.u32 2147483648, %v1012_v23  ;;  %v900_v37 = vshrl.u32 %v882_v5, %v898_v25  ;;  %v903_v11 = vadd.s32 127, %v902_v3 }
 0x19d   :  { %v1014_v39 = vsel %vm931_vm14, %v1013_v27, %v1012_v23  ;;  %v901_v41 = vor.u32 %v900_v37, %v899_v35  ;;  %v904_v42 = vshll.u32 %v903_v11, 23  ;;  %v1263_v23 = vstv %s1328_s2 }
 0x19e   :  { %v1017_v33 = vsel %vm930_vm15, %v2036_v9, %v1014_v39  ;;  %vm1132_vm14 = vcmp.eq.s32.totalorder %v1130_v30, 0  ;;  %vm1131_vm15 = vcmp.lt.s32.totalorder %v1130_v30, 2 }
 0x19f   :  { %1584 = vcosq.f32 %v1017_v33  ;;  %v905_v36 = vor.u32 4788187, %v904_v42  ;;  %v908_v49 = vcvt.s32.f32 %v901_v41  ;;  %v732_v41 = vpop.f32.mrf.mxu0 }
 0x1a0   :  { %1586 = vsinq.f32 %v1017_v33  ;;  %v741_v22 = vmul.f32 0.0078125, %v732_v41 }
 0x1a1   :  { %v906_v44 = vand.u32 2147483647, %v905_v36  ;;  %v809_v36 = vpop.f32.mrf.mxu1 }
 0x1a2   :  { %v818_v29 = vmul.f32 0.0078125, %v809_v36 }
 0x1a3   :  { %v909_v51 = vmul.f32 %v908_v49, %v906_v44 }
 0x1a5   :  { %v910_v16 = vxor.u32 2147483648, %v909_v51 }
 0x1a7   :  { %v911_v45 = vsel %vm828_vm0, %v910_v16, %v909_v51  ;;  %vm1282_vm0 = vcmask 7168  }
 0x1a8   :  { %v914_v47 = vsel %vm2124_vm1, %v2040_v15, %v911_v45  ;;  %vm1285_vm1 = vcmask 15360  }
 0x1a9   :  { %1588 = vcosq.f32 %v914_v47 }
 0x1aa   :  { %1590 = vsinq.f32 %v914_v47 }
 0x1ab   :  { %1592 = vpow2.f32 %v822_v53 }
 0x1ac   :  { %v1585_v57 = vpop.eup %1584 }
 0x1ad   :  { %v1587_v58 = vpop.eup %1586  ;;  %v1028_v26 = vxor.u32 2147483648, %v1585_v57 }
 0x1ae   :  { %v1025_v19 = vxor.u32 2147483648, %v1587_v58 }
 0x1af   :  { %v1029_v61 = vsel %vm1027_vm4, %v1028_v26, %v1587_v58  ;;  %v1241_v60 = vsel %vm1239_vm5, %v1028_v26, %v1587_v58 }
 0x1b0   :  { %v1026_v63 = vsel %vm1024_vm6, %v1585_v57, %v1025_v19  ;;  %v1238_v1 = vsel %vm1236_vm7, %v1585_v57, %v1025_v19 }
 0x1b1   :  { %v1030_v14 = vsel %vm1023_vm3, %v1026_v63, %v1029_v61  ;;  %v1242_v48 = vsel %vm1235_vm8, %v1238_v1, %v1241_v60 }
 0x1b2   :  { %v1031_v18 = vsel %vm1021_vm2, nan, %v1030_v14  ;;  %v1243_v8 = vsel %vm1021_vm2, nan, %v1242_v48 }
 0x1b3   :  { %v1033_v20 = vmul.f32 %v1583_v52, %v1031_v18  ;;  %v1245_v24 = vmul.f32 %v1243_v8, %v1035_v59 }
 0x1b5   :  { %v1247_v31 = vmul.f32 %v1033_v20, %v742_v10  ;;  %v1253_v32 = vmul.f32 %v1245_v24, %v742_v10  ;;  %v1249_v2 = vmul.f32 %v1245_v24, %v819_v17  ;;  %v1255_v34 = vmul.f32 %v1033_v20, %v819_v17 }
 0x1b6   :  { %v1589_v4 = vpop.eup %1588 }
 0x1b7   :  { %v1251_v5 = vsub.f32 %v1247_v31, %v1249_v2  ;;  %v1257_v25 = vadd.f32 %v1255_v34, %v1253_v32  ;;  %v1591_v3 = vpop.eup %1590  ;;  %v925_v9 = vxor.u32 2147483648, %v1589_v4 }
 0x1b8   :  { %v1593_v27 = vpop.eup %1592  ;;  %v922_v11 = vxor.u32 2147483648, %v1591_v3 }
 0x1b9   :  { %v1262_v35 = vmul.f32 %v1260_v12, %v1251_v5  ;;  %v1265_v37 = vmul.f32 %v1263_v23, %v1257_v25  ;;  %v1269_v38 = vmul.f32 %v1263_v23, %v1251_v5  ;;  %v926_v39 = vsel %vm924_vm12, %v925_v9, %v1591_v3 }
 0x1ba   :  { %v1137_v40 = vsel %vm1135_vm13, %v925_v9, %v1591_v3  ;;  %v1271_v33 = vmul.f32 %v1260_v12, %v1257_v25  ;;  %v923_v42 = vsel %vm921_vm11, %v1589_v4, %v922_v11  ;;  %v1134_v43 = vsel %vm1132_vm14, %v1589_v4, %v922_v11 }
 0x1bb   :  { %v1267_v46 = vsub.f32 %v1262_v35, %v1265_v37  ;;  %v927_v44 = vsel %vm920_vm10, %v923_v42, %v926_v39  ;;  %v1034_v49 = vsub.f32 0.0, %v1593_v27  ;;  %v1138_v50 = vsel %vm1131_vm15, %v1134_v43, %v1137_v40 }
 0x1bc   :  { %v1273_v13 = vadd.f32 %v1271_v33, %v1269_v38  ;;  %v928_v51 = vsel %vm918_vm9, nan, %v927_v44  ;;  %v1139_v16 = vsel %vm918_vm9, nan, %v1138_v50 }
 0x1bd   :  { %v1032_v21 = vmul.f32 %v1593_v27, %v928_v51  ;;  %v1244_v53 = vmul.f32 %v1139_v16, %v1034_v49 }
 0x1be   :  { %1278 = vrot.lane.b32.xlu1 %v1273_v13, %s1642_s30 }
 0x1bf   :  { %v1246_v45 = vmul.f32 %v1032_v21, %v741_v22  ;;  %v1252_v47 = vmul.f32 %v1244_v53, %v741_v22  ;;  %v1248_v52 = vmul.f32 %v1244_v53, %v818_v29  ;;  %v1254_v54 = vmul.f32 %v1032_v21, %v818_v29 }
 0x1c1   :  { %v1250_v55 = vsub.f32 %v1246_v45, %v1248_v52  ;;  %v1256_v56 = vadd.f32 %v1254_v54, %v1252_v47 }
 0x1c3   :  { %v1261_v57 = vmul.f32 %v1260_v12, %v1250_v55  ;;  %v1264_v58 = vmul.f32 %v1263_v23, %v1256_v56  ;;  %v1268_v26 = vmul.f32 %v1263_v23, %v1250_v55  ;;  %v1270_v59 = vmul.f32 %v1260_v12, %v1256_v56 }
 0x1c5   :  { %v1272_v62 = vadd.f32 %v1270_v59, %v1268_v26  ;;  %v1266_v19 = vsub.f32 %v1261_v57, %v1264_v58 }
 0x1c7   :  { %1276 = vrot.lane.b32.xlu0 %v1272_v62, %s1642_s30 }
 0x230   :  { %v1279_v15 = vpop.permute.xlu1 %1278 }
 0x231   :  { %v1284_v61 = vsel %vm1282_vm0, %v1267_v46, %v1279_v15 }
 0x232   :  { %1287 = vst.msk [vmem:[%s2159_s4 + $0x8] sm:$0xff] %vm1285_vm1, %v1284_v61 }
 0x239   :  { %v1277_v60 = vpop.permute.xlu0 %1276 }
 0x23a   :  { %v1283_v0 = vsel %vm1282_vm0, %v1266_v19, %v1277_v60 }
 0x23b   :  { %1286 = vst.msk [vmem:[%s2159_s4] sm:$0xff] %vm1285_vm1, %v1283_v0 }
 0x23c   :  { %1292 = vsyncpa [#allocation3], 1 }
 0x23d   :  { %1293 = vsyncpa [#allocation4], 1 }

</bundles_post_ra>
